<compile_context>
chip_gen: v7x
topology: tpu7x:2x2x1
jax: 0.10.0
libtpu: 0.0.40
codegen_flags: <defaults>
</compile_context>

<pallas_src>
import functools

import jax
import jax.numpy as jnp
from jax.experimental import pallas as pl
from jax.experimental.pallas import tpu as pltpu

LN_EPS = 1e-5  # nn.LayerNorm default


def _add_norm_kernel(*refs, residual):
    # residual=True : (new_ref, old_ref, gamma_ref, beta_ref, out_ref)
    # residual=False: (new_ref, gamma_ref, beta_ref, out_ref)   -- `old` never DMA'd
    if residual:
        new_ref, old_ref, gamma_ref, beta_ref, out_ref = refs
        x = old_ref[...].astype(jnp.float32) + new_ref[...].astype(jnp.float32)
    else:
        new_ref, gamma_ref, beta_ref, out_ref = refs
        x = new_ref[...].astype(jnp.float32)
    mean = jnp.mean(x, axis=-1, keepdims=True)
    centered = x - mean
    var = jnp.mean(centered * centered, axis=-1, keepdims=True)
    inv = jax.lax.rsqrt(var + LN_EPS)
    y = centered * inv
    y = y * gamma_ref[...].astype(jnp.float32) + beta_ref[...].astype(jnp.float32)
    out_ref[...] = y.astype(out_ref.dtype)


def _vmem_budgets():
    """(tile_budget_bytes, vmem_limit_bytes) derived from the chip generation.

    128 MiB parts (v5e/v6e): large budget + explicit 64 MiB limit (v5e's scoped
    default is only 16 MiB, so the explicit limit is mandatory there).
    64 MiB per-TC parts (v7x) or unknown: stay well under 64 MiB.
    """
    try:
        cap = int(pltpu.get_tpu_info().vmem_capacity_bytes)
    except Exception:
        cap = 64 << 20  # conservative fallback: v7x per-TC VMEM
    if cap >= (128 << 20):
        return 48 << 20, 64 << 20
    return 36 << 20, 48 << 20


def _pick_row_tile(rows, d_model, itemsize, n_streamed, tile_budget_bytes, max_tile=4096):
    """Largest row tile (multiple of 8) that fits the budget, incl. f32 temps.

    Per row of tile:
      * n_streamed tiled arrays (new[, old], out) x 2 pipeline buffers in the
        I/O dtype,
      * ~3 f32 compute intermediates (x / centered / y) that may spill to VMEM.
    Also clamped so the grid has >= 4 steps (2 TCs x double buffering on v7x).
    """
    per_row_bytes = (2 * n_streamed * itemsize + 3 * 4) * d_model
    t = tile_budget_bytes // max(per_row_bytes, 1)
    t = max(8, min(int(t), max_tile))
    t = (t // 8) * 8
    # keep >= 4 grid steps so both v7x TensorCores get >= 2 pipelined steps each
    min_steps = 4
    t_cap = ((pl.cdiv(rows, min_steps) + 7) // 8) * 8
    return max(8, min(t, t_cap))


def add_norm(new, old, gamma, beta, *, residual=True, drop_flag=1, row_tile=None):
    """Pallas implementation of Add_Norm.forward (eval-mode dropout)."""
    del drop_flag  # dropout is identity at inference time
    assert new.shape == old.shape
    B, L, D = new.shape
    rows = B * L
    itemsize = jnp.dtype(new.dtype).itemsize

    tile_budget, vmem_limit = _vmem_budgets()
    # streamed tiled arrays: new (+ old if residual) + out
    n_streamed = 3 if residual else 2
    if row_tile is None:
        row_tile = _pick_row_tile(rows, D, itemsize, n_streamed, tile_budget)

    new2 = new.reshape(rows, D)
    old2 = old.reshape(rows, D)
    gamma2 = gamma.reshape(1, D)
    beta2 = beta.reshape(1, D)

    grid = (pl.cdiv(rows, row_tile),)
    kernel = functools.partial(_add_norm_kernel, residual=residual)

    tile_spec = pl.BlockSpec((row_tile, D), lambda i: (i, 0))
    vec_spec = pl.BlockSpec((1, D), lambda i: (0, 0))

    if residual:
        in_specs = [tile_spec, tile_spec, vec_spec, vec_spec]
        args = (new2, old2, gamma2, beta2)
    else:
        # `old` is never passed -> never DMA'd on this path
        in_specs = [tile_spec, vec_spec, vec_spec]
        args = (new2, gamma2, beta2)

    n_in_tiled = 2 if residual else 1
    param_itemsize = jnp.dtype(gamma.dtype).itemsize
    cost = pl.CostEstimate(
        flops=(9 if residual else 8) * rows * D,
        transcendentals=rows,
        bytes_accessed=(n_in_tiled + 1) * rows * D * itemsize + 2 * D * param_itemsize,
    )

    out = pl.pallas_call(
        kernel,
        out_shape=jax.ShapeDtypeStruct((rows, D), new.dtype),
        grid_spec=pltpu.PrefetchScalarGridSpec(
            num_scalar_prefetch=0,
            grid=grid,
            in_specs=in_specs,
            out_specs=pl.BlockSpec((row_tile, D), lambda i: (i, 0)),
        ),
        compiler_params=pltpu.CompilerParams(
            dimension_semantics=("parallel",),
            vmem_limit_bytes=vmem_limit,
        ),
        cost_estimate=cost,
    )(*args)

    return out.reshape(B, L, D)


def add_norm_ref(new, old, gamma, beta, *, residual=True):
    """Pure-JAX reference (eval-mode)."""
    x = (old + new) if residual else new
    x = x.astype(jnp.float32)
    mean = jnp.mean(x, axis=-1, keepdims=True)
    var = jnp.mean((x - mean) ** 2, axis=-1, keepdims=True)
    y = (x - mean) * jax.lax.rsqrt(var + LN_EPS)
    return (y * gamma + beta).astype(new.dtype)


if __name__ == "__main__":
    key = jax.random.PRNGKey(0)

    # --- main check: lane-dense d_model (multiple of 128), residual=True ---
    B, L, D = 2, 8, 128  # batch, seq, d_model
    k1, k2 = jax.random.split(key)
    new = jax.random.normal(k1, (B, L, D), dtype=jnp.float32)
    old = jax.random.normal(k2, (B, L, D), dtype=jnp.float32)

    # nn.LayerNorm(d_model) default init: weight = ones, bias = zeros
    gamma = jnp.ones((D,), dtype=jnp.float32)
    beta = jnp.zeros((D,), dtype=jnp.float32)

    out = add_norm(new, old, gamma, beta, residual=True, drop_flag=1)
    jax.block_until_ready(out)
    ref = add_norm_ref(new, old, gamma, beta, residual=True)
    assert out.shape == (B, L, D)
    assert jnp.allclose(out, ref, atol=1e-5, rtol=1e-5), "mismatch vs reference (residual=True)"

    # --- second check: partial last block (rows not a multiple of the tile),
    #     small d_model, residual=False path (old is never DMA'd) ---
    B2, L2, D2 = 3, 5, 32  # rows = 15, forces a clipped last block
    k3, k4 = jax.random.split(k1)
    new2 = jax.random.normal(k3, (B2, L2, D2), dtype=jnp.float32)
    old2 = jax.random.normal(k4, (B2, L2, D2), dtype=jnp.float32)
    gamma2 = jnp.ones((D2,), dtype=jnp.float32)
    beta2 = jnp.zeros((D2,), dtype=jnp.float32)

    out2 = add_norm(new2, old2, gamma2, beta2, residual=False, drop_flag=1, row_tile=8)
    jax.block_until_ready(out2)
    ref2 = add_norm_ref(new2, old2, gamma2, beta2, residual=False)
    assert out2.shape == (B2, L2, D2)
    assert jnp.allclose(out2, ref2, atol=1e-5, rtol=1e-5), "mismatch vs reference (residual=False)"

    # --- third check: bf16 I/O, auto row_tile, residual=True ---
    B3, L3, D3 = 2, 16, 128
    k5, k6 = jax.random.split(k3)
    new3 = jax.random.normal(k5, (B3, L3, D3), dtype=jnp.bfloat16)
    old3 = jax.random.normal(k6, (B3, L3, D3), dtype=jnp.bfloat16)
    gamma3 = jnp.ones((D3,), dtype=jnp.float32)
    beta3 = jnp.zeros((D3,), dtype=jnp.float32)

    out3 = add_norm(new3, old3, gamma3, beta3, residual=True, drop_flag=1)
    jax.block_until_ready(out3)
    ref3 = add_norm_ref(new3, old3, gamma3, beta3, residual=True)
    assert out3.shape == (B3, L3, D3)
    assert jnp.allclose(out3.astype(jnp.float32), ref3.astype(jnp.float32),
                        atol=2e-2, rtol=2e-2), "mismatch vs reference (bf16)"

    print("KERNEL_OK")
</pallas_src>

<mosaic_0001>
module attributes {stable_mosaic.version = 11 : i64} {
  func.func @_add_norm_kernel(%arg0: i32, %arg1: memref<8x128xf32, #tpu.memory_space<vmem>>, %arg2: memref<8x128xf32, #tpu.memory_space<vmem>>, %arg3: memref<1x128xf32, #tpu.memory_space<vmem>>, %arg4: memref<1x128xf32, #tpu.memory_space<vmem>>, %arg5: memref<8x128xf32, #tpu.memory_space<vmem>>) attributes {dimension_semantics = [#tpu.dimension_semantics<parallel>], iteration_bounds = array<i64: 2>, scalar_prefetch = 0 : i64, scratch_operands = 0 : i64, tpu.core_type = #tpu.core_type<tc>, window_params = [{transform_indices = @transform_0, window_bounds = array<i64: 8, 128>}, {transform_indices = @transform_1, window_bounds = array<i64: 8, 128>}, {pipeline_mode = #tpu.pipeline_mode<synchronous>, transform_indices = @transform_2, window_bounds = array<i64: 1, 128>}, {pipeline_mode = #tpu.pipeline_mode<synchronous>, transform_indices = @transform_3, window_bounds = array<i64: 1, 128>}, {transform_indices = @transform_4, window_bounds = array<i64: 8, 128>}]} {
    %c0 = arith.constant 0 : index
    %c0_0 = arith.constant 0 : index
    %0 = vector.load %arg2[%c0, %c0_0] : memref<8x128xf32, #tpu.memory_space<vmem>>, vector<8x128xf32>
    %c0_1 = arith.constant 0 : index
    %c0_2 = arith.constant 0 : index
    %1 = vector.load %arg1[%c0_1, %c0_2] : memref<8x128xf32, #tpu.memory_space<vmem>>, vector<8x128xf32>
    %2 = arith.addf %0, %1 : vector<8x128xf32>
    %cst = arith.constant dense<0.000000e+00> : vector<8xf32>
    %3 = vector.multi_reduction <add>, %2, %cst [1] : vector<8x128xf32> to vector<8xf32>
    %4 = vector.shape_cast %3 : vector<8xf32> to vector<8x1xf32>
    %cst_3 = arith.constant 1.280000e+02 : f32
    %5 = vector.broadcast %cst_3 : f32 to vector<8x1xf32>
    %6 = arith.divf %4, %5 : vector<8x1xf32>
    %7 = vector.broadcast %6 : vector<8x1xf32> to vector<8x128xf32>
    %8 = arith.subf %2, %7 : vector<8x128xf32>
    %9 = arith.mulf %8, %8 : vector<8x128xf32>
    %cst_4 = arith.constant dense<0.000000e+00> : vector<8xf32>
    %10 = vector.multi_reduction <add>, %9, %cst_4 [1] : vector<8x128xf32> to vector<8xf32>
    %11 = vector.shape_cast %10 : vector<8xf32> to vector<8x1xf32>
    %cst_5 = arith.constant 1.280000e+02 : f32
    %12 = vector.broadcast %cst_5 : f32 to vector<8x1xf32>
    %13 = arith.divf %11, %12 : vector<8x1xf32>
    %cst_6 = arith.constant 9.99999974E-6 : f32
    %14 = vector.broadcast %cst_6 : f32 to vector<8x1xf32>
    %15 = arith.addf %13, %14 : vector<8x1xf32>
    %16 = math.rsqrt %15 : vector<8x1xf32>
    %17 = vector.broadcast %16 : vector<8x1xf32> to vector<8x128xf32>
    %18 = arith.mulf %8, %17 : vector<8x128xf32>
    %c0_7 = arith.constant 0 : index
    %c0_8 = arith.constant 0 : index
    %19 = vector.load %arg3[%c0_7, %c0_8] : memref<1x128xf32, #tpu.memory_space<vmem>>, vector<1x128xf32>
    %20 = vector.broadcast %19 : vector<1x128xf32> to vector<8x128xf32>
    %21 = arith.mulf %18, %20 : vector<8x128xf32>
    %c0_9 = arith.constant 0 : index
    %c0_10 = arith.constant 0 : index
    %22 = vector.load %arg4[%c0_9, %c0_10] : memref<1x128xf32, #tpu.memory_space<vmem>>, vector<1x128xf32>
    %23 = vector.broadcast %22 : vector<1x128xf32> to vector<8x128xf32>
    %24 = arith.addf %21, %23 : vector<8x128xf32>
    %c0_11 = arith.constant 0 : index
    %c0_12 = arith.constant 0 : index
    %25 = vector.load %arg5[%c0_11, %c0_12] : memref<8x128xf32, #tpu.memory_space<vmem>>, vector<8x128xf32>
    tpu.vector_store %arg5[%c0_11, %c0_12], %24 {strides = array<i32>} : memref<8x128xf32, #tpu.memory_space<vmem>>, vector<8x128xf32>,
    return
  }
  func.func @transform_0(%arg0: i32) -> (i32, i32) {
    %c0_i32 = arith.constant 0 : i32
    %c0_i32_0 = arith.constant 0 : i32
    return %arg0, %c0_i32 : i32, i32
  }
  func.func @transform_1(%arg0: i32) -> (i32, i32) {
    %c0_i32 = arith.constant 0 : i32
    %c0_i32_0 = arith.constant 0 : i32
    return %arg0, %c0_i32 : i32, i32
  }
  func.func @transform_2(%arg0: i32) -> (i32, i32) {
    %c0_i32 = arith.constant 0 : i32
    %c0_i32_0 = arith.constant 0 : i32
    %c0_i32_1 = arith.constant 0 : i32
    return %c0_i32, %c0_i32_0 : i32, i32
  }
  func.func @transform_3(%arg0: i32) -> (i32, i32) {
    %c0_i32 = arith.constant 0 : i32
    %c0_i32_0 = arith.constant 0 : i32
    %c0_i32_1 = arith.constant 0 : i32
    return %c0_i32, %c0_i32_0 : i32, i32
  }
  func.func @transform_4(%arg0: i32) -> (i32, i32) {
    %c0_i32 = arith.constant 0 : i32
    %c0_i32_0 = arith.constant 0 : i32
    return %arg0, %c0_i32 : i32, i32
  }
}

</mosaic_0001>

<bundles_post_ra>
// kernel: tpu_custom_call.1
= control target key start
LH: loop header
LB: loop body
LE: loop exit
PB: predicated region body
PF: predicated region fallthrough
CT: control target
= control target key end

     0   :  { %9 = vsyncpa [#allocation3], 0  ;;  %s839_s0 = inlined_call_operand.hbm [shape: f32[16,128], index: 0, kind: input, shape index: {}]   ;;  %s840_s1 = inlined_call_operand.hbm [shape: f32[16,128], index: 1, kind: input, shape index: {}]   ;;  %s841_s2 = inlined_call_operand.vmem [shape: f32[1,128], index: 2, kind: input, shape index: {}]   ;;  %s842_s3 = inlined_call_operand.vmem [shape: f32[1,128], index: 3, kind: input, shape index: {}]   ;;  %s843_s4 = inlined_call_operand.hbm [shape: f32[16,128], index: 4, kind: output, shape index: {}]  }
   0x1   :  { %11 = vsyncpa [#allocation3 + $0x1], 0 }
   0x2   :  { %12 = vsyncpa [#allocation6], 0 }
   0x3   :  { %14 = vsyncpa [#allocation6 + $0x1], 0 }
   0x4   :  { %15 = vsyncpa [#allocation4], 0 }
   0x5   :  { %17 = vsyncpa [#allocation4 + $0x1], 0  ;;  %s619_s15 = smov 0   ;;  %s621_s16 = smov 0  }
   0x6   :  { %s623_s17 = smov 0   ;;  %s625_s18 = smov 0  }
   0x7 LB: > { %s640_s19 = sadd.s32 4294967295, %s589_s18   ;;  %s389_s20 = sadd.s32 4294967294, %s589_s18   ;;  %s589_s18 = sphi %s625_s18, %s862_s18   ;;  %s585_s17 = sphi %s623_s17, %s861_s17   ;;  %s581_s16 = sphi %s621_s16, %s860_s16   ;;  %s577_s15 = sphi %s619_s15, %s859_s15  }
   0x8   : > { %s644_s21 = sadd.s32 1, %s589_s18   ;;  %s30_s22 = sadd.s32 1, %s585_s17 }
   0x9   : > { %s27_s23 = ssub.s32 %s589_s18, %s644_s21  ;;  %p37_p0 = scmp.ne.s32.totalorder %s585_s17, %s581_s16 }
   0xa   : > { %p28_p1 = scmp.eq.s32.totalorder %s27_s23, 0  ;;  %p38_p2 = scmp.eq.s32.totalorder %s589_s18, 0 }
   0xb   : > { %p43_p3 = scmp.ne.s32.totalorder %s581_s16, %s577_s15  ;;  %p44_p4 = scmp.eq.s32.totalorder %s640_s19, 0 }
   0xc   : > { %s656_s24 = scalar_select %p28_p1, %s585_s17, %s30_s22  }
   0xd   : > { %p658_p5 = por %p38_p2, %p37_p0  ;;  %p662_p6 = por %p44_p4, %p43_p3 }
   0xe   : > { %p135_p7 = scmp.eq.s32.totalorder %s640_s19, 1  ;;  %p141_p8 = scmp.eq.s32.totalorder %s389_s20, 1 }
   0xf   : > { %s847_s26 = scalar_select %p662_p6, 1, 0 }
  0x10   : > { %p423_p10 = scmp.lt.s32.totalorder %s589_s18, 2  ;;  %p669_p11 = por %p135_p7, %p37_p0 }
  0x11   : > { %p673_p12 = por %p141_p8, %p43_p3  ;;  %s678_s29 = sand.u32 1, %s585_s17  }
  0x12   : > { %s848_s27 = scalar_select %p669_p11, 1, 0 }
  0x13   : > { %s849_s28 = scalar_select %p673_p12, 1, 0 }
  0x14   : > { %s393_s30 = sshll.u32 %s589_s18, 7  ;;  %s392_s5 = sshll.u32 %s678_s29, 3 }
  0x15   : > { %s687_s8 = scalar_lea.hbm %s839_s0, %s393_s30  ;;  %s171_s9 = scalar_lea.vmem [#allocation2], %s392_s5 }
  0x16   : > { %s178_s10 = sshll.u32 %s171_s9, 4  ;;  %p693_p13 = pnand %p423_p10, %p658_p5  ;;  %s697_s10 = int_to_ptr.vmem [resolvable:$true] %s178_s10 }
  0x17   : > { %s168_s12 = scalar_lea.sflag [#allocation3], %s678_s29  ;;  %s459_s13 = scalar_lea.hbm %s687_s8, 128 }
  0x18   : > { %p460_p2 = scmp.ne.s32.totalorder %s687_s8, %s459_s13  ;;  %p461_p3 = pneg %p693_p13 }
  0x19   : > { %s464_s22 = scalar_lea.hbm %s839_s0, 256  ;;  %p465_p5 = scmp.lt.u32.totalorder %s687_s8, %s839_s0 }
  0x1a   : > { %p462_p4 = pnand %p461_p3, %p460_p2  ;;  %p466_p8 = scmp.lt.u32.totalorder %s464_s22, %s459_s13 }
  0x1b   : > { %p468_p9 = scmp.lt.u32.totalorder %s459_s13, %s687_s8 }
  0x1c   : > { %p463_p7 = pneg %p462_p4  ;;  %p467_p10 = por %p466_p8, %p465_p5 }
  0x1e   : > { %p469_p0 = por %p468_p9, %p467_p10 }
  0x20   : > { %p470_p1 = pnand %p469_p0, %p463_p7 }
  0x22   : > { %473 = shalt.err (!%p470_p1)
}
  0x23   : > { %s474_s6 = scalar_lea.vmem %s697_s10, 128  ;;  %s591_s7 = smov [#allocation2]  }
  0x24   : > { %p475_p2 = scmp.ne.s32.totalorder %s697_s10, %s474_s6  ;;  %s479_s9 = sshll.u32 %s591_s7, 4  ;;  %s480_s9 = int_to_ptr.vmem [resolvable:$false] %s479_s9 }
  0x25   : > { %s481_s14 = scalar_lea.vmem %s480_s9, 256  ;;  %p482_p11 = scmp.lt.s32.totalorder %s697_s10, %s480_s9 }
  0x26   : > { %p477_p4 = pnand %p475_p2, %p461_p3  ;;  %p483_p5 = scmp.lt.s32.totalorder %s481_s14, %s474_s6 }
  0x28   : > { %p478_p12 = pneg %p477_p4  ;;  %p484_p8 = por %p483_p5, %p482_p11 }
  0x2a   : > { %p485_p9 = pnand %p484_p8, %p478_p12 }
  0x2c   : > { %488 = shalt.err (!%p485_p9)
}
  0x2d   : > { %415 = dma.hbm_to_vmem [thread:$0]  (!%p693_p13), %s687_s8, 128, %s697_s10, %s168_s12  }
  0x2e   : > { %p851_p0 = scmp.lt.s32.totalorder %s589_s18, 3  ;;  %p852_p1 = scmp.ge.s32.totalorder %s589_s18, 1 }
  0x2f   : > { %s740_s23 = scalar_lea.hbm %s840_s1, %s393_s30  ;;  %s189_s25 = scalar_lea.vmem [#allocation5], %s392_s5 }
  0x30   : > { %p731_p7 = pnand %p852_p1, %p851_p0  ;;  %s196_s6 = sshll.u32 %s189_s25, 4  ;;  %s197_s6 = int_to_ptr.vmem [resolvable:$true] %s196_s6 }
  0x31   : > { %s186_s8 = scalar_lea.sflag [#allocation6], %s678_s29  ;;  %s489_s10 = scalar_lea.hbm %s740_s23, 128 }
  0x32   : > { %s853_s13 = scalar_select %p731_p7, 1, 0 }
  0x33   : > { %p490_p11 = scmp.ne.s32.totalorder %s740_s23, %s489_s10  ;;  %s494_s30 = scalar_lea.hbm %s840_s1, 256 }
  0x34   : > { %p495_p2 = scmp.lt.u32.totalorder %s740_s23, %s840_s1  ;;  %p496_p4 = scmp.lt.u32.totalorder %s494_s30, %s489_s10 }
  0x35   : > { %p492_p12 = pnand %p490_p11, %p461_p3  ;;  %p498_p8 = scmp.lt.u32.totalorder %s489_s10, %s740_s23 }
  0x36   : > { %p497_p5 = por %p496_p4, %p495_p2 }
  0x37   : > { %p493_p10 = pneg %p492_p12 }
  0x38   : > { %p499_p9 = por %p498_p8, %p497_p5 }
  0x3a   : > { %p500_p0 = pnand %p499_p9, %p493_p10 }
  0x3c   : > { %503 = shalt.err (!%p500_p0)
}
  0x3d   : > { %s504_s29 = scalar_lea.vmem %s197_s6, 128  ;;  %s592_s5 = smov [#allocation5]  }
  0x3e   : > { %p505_p1 = scmp.ne.s32.totalorder %s197_s6, %s504_s29  ;;  %s509_s20 = sshll.u32 %s592_s5, 4  ;;  %s510_s20 = int_to_ptr.vmem [resolvable:$false] %s509_s20 }
  0x3f   : > { %s511_s22 = scalar_lea.vmem %s510_s20, 256  ;;  %p512_p6 = scmp.lt.s32.totalorder %s197_s6, %s510_s20 }
  0x40   : > { %p507_p11 = pnand %p505_p1, %p461_p3  ;;  %p513_p7 = scmp.lt.s32.totalorder %s511_s22, %s504_s29 }
  0x42   : > { %p508_p12 = pneg %p507_p11  ;;  %p514_p2 = por %p513_p7, %p512_p6 }
  0x44   : > { %p515_p4 = pnand %p514_p2, %p508_p12 }
  0x46   : > { %518 = shalt.err (!%p515_p4)
}
  0x47   : > { %418 = dma.hbm_to_vmem [thread:$0]  (!%p693_p13), %s740_s23, 128, %s197_s6, %s186_s8  }
  0x48   : > { %p854_p10 = scmp.ne.s32.totalorder %s853_s13, 0 }
  0x49   : > { %s767_s25 = sand.u32 (!%p854_p10), 1, %s581_s16   ;;  %p855_p6 = scmp.ne.s32.totalorder (!%p854_p10), %s847_s26, 0 }
  0x4a   : > { %205 = sbr.rel (%p854_p10) target bundleno = 412 (0x19c), region = 36  ;;  %s770_s10 = sshll.u32 (!%p854_p10), %s767_s25, 3 }
  0x4b   : > { %s208_s12 = scalar_lea.sflag (!%p854_p10), [#allocation3], %s767_s25  ;;  %s211_s7 = scalar_lea.vmem (!%p854_p10), [#allocation2], %s770_s10 }
  0x51   : > { %564 = dma.done.wait (%p855_p6), %s208_s12, 128  }
  0x52   : > { %566 = vsyncadd (%p855_p6), %s208_s12, 4294967168  ;;  %s217_s11 = scalar_lea.sflag [#allocation6], %s767_s25  ;;  %s220_s13 = scalar_lea.vmem [#allocation5], %s770_s10 }
  0x53   : > { %568 = dma.done.wait (%p855_p6), %s217_s11, 128  }
  0x54   : > { %570 = vsyncadd (%p855_p6), %s217_s11, 4294967168  ;;  %v250_v0 = vld [vmem:[%s220_s13] sm:$0xff]  ;;  %v251_v1 = vld [vmem:[%s211_s7] sm:$0xff]  ;;  %s403_s30 = sshll.u32 %s640_s19, 7  ;;  %s249_s9 = scalar_lea.vmem [#allocation7], %s770_s10 }
  0x55   : > { %v252_v2 = vadd.f32 %v251_v1, %v250_v0  ;;  %v400_v11 = vld [vmem:[%s841_s2] ss:$0 sm:$0xff]  ;;  %s296_s14 = sshll.u32 %s249_s9, 4  ;;  %s795_s20 = scalar_lea.hbm %s843_s4, %s403_s30  ;;  %s797_s14 = int_to_ptr.vmem [resolvable:$true] %s296_s14 }
  0x56   : > { %v401_v13 = vld [vmem:[%s842_s3] ss:$0 sm:$0xff]  ;;  %s283_s22 = scalar_lea.sflag [#allocation4], %s767_s25  ;;  %s519_s12 = scalar_lea.vmem %s797_s14, 128 }
  0x57   : > { %253 = vadd.xlane.f32.xlu0 %v252_v2  ;;  %p520_p13 = scmp.ne.s32.totalorder %s797_s14, %s519_s12  ;;  %p856_p3 = scmp.ne.s32.totalorder %s848_s27, 0 }
  0x58   : > { %s593_s19 = smov [#allocation7]  }
  0x59   : > { %p521_p7 = pnand %p520_p13, %p856_p3  ;;  %s523_s10 = sshll.u32 %s593_s19, 4  ;;  %s524_s10 = int_to_ptr.vmem [resolvable:$false] %s523_s10 }
  0x5a   : > { %s525_s7 = scalar_lea.vmem %s524_s10, 256  ;;  %p526_p8 = scmp.lt.s32.totalorder %s797_s14, %s524_s10 }
  0x5b   : > { %p522_p5 = pneg %p521_p7  ;;  %p527_p9 = scmp.lt.s32.totalorder %s525_s7, %s519_s12 }
  0x5d   : > { %p528_p0 = por %p527_p9, %p526_p8 }
  0x5f   : > { %p529_p1 = pnand %p528_p0, %p522_p5 }
  0xe4   : > { %v254_v3 = vpop.xlane.xlu0 %253 }
  0xe5   : > { %v256_v4 = vmul.f32 0.0078125, %v254_v3 }
  0xe7   : > { %v257_v5 = vsub.f32 %v252_v2, %v256_v4 }
  0xe9   : > { %v258_v6 = vmul.f32 %v257_v5, %v257_v5 }
  0xeb   : > { %259 = vadd.xlane.f32.xlu0 %v258_v6 }
 0x178   : > { %v260_v7 = vpop.xlane.xlu0 %259 }
 0x179   : > { %v261_v8 = vmul.f32 0.0078125, %v260_v7 }
 0x17b   : > { %v262_v9 = vadd.f32 1e-05, %v261_v8 }
 0x17d   : > { %457 = vrsqrt.f32 %v262_v9 }
 0x187   : > { %v458_v10 = vpop.eup %457 }
 0x188   : > { %v264_v12 = vmul.f32 %v458_v10, %v257_v5 }
 0x18a   : > { %v272_v14 = vmul.f32 %v400_v11, %v264_v12 }
 0x18c   : > { %v280_v15 = vadd.f32 %v401_v13, %v272_v14 }
 0x18e   : > { %281 = vst [vmem:[%s249_s9] sm:$0xff] %v280_v15 }
 0x18f   : > { %532 = shalt.err (!%p529_p1)
}
 0x190   : > { %s533_s25 = scalar_lea.hbm %s795_s20, 128  ;;  %s537_s26 = scalar_lea.hbm %s843_s4, 256 }
 0x191   : > { %p534_p11 = scmp.ne.s32.totalorder %s795_s20, %s533_s25  ;;  %p538_p4 = scmp.lt.u32.totalorder %s795_s20, %s843_s4 }
 0x192   : > { %p539_p10 = scmp.lt.u32.totalorder %s537_s26, %s533_s25  ;;  %p541_p13 = scmp.lt.u32.totalorder %s533_s25, %s795_s20 }
 0x193   : > { %p535_p12 = pnand %p534_p11, %p856_p3 }
 0x194   : > { %p540_p6 = por %p539_p10, %p538_p4 }
 0x195   : > { %p536_p2 = pneg %p535_p12 }
 0x196   : > { %p542_p7 = por %p541_p13, %p540_p6 }
 0x198   : > { %p543_p5 = pnand %p542_p7, %p536_p2 }
 0x19a   : > { %546 = shalt.err (!%p543_p5)
}
 0x19b   : > { %410 = dma.vmem_to_hbm [thread:$0]  (%p856_p3), %s797_s14, 128, %s795_s20, %s283_s22  }
 0x19c PF: > { %s308_s8 = sand.u32 1, %s577_s15   ;;  %p857_p8 = scmp.ne.s32.totalorder %s849_s28, 0 }
 0x19d   : > { %p858_p9 = scmp.ge.s32.totalorder %s589_s18, 2  ;;  %s309_s30 = scalar_lea.sflag [#allocation4], %s308_s8 }
 0x19f   : > { %p420_p0 = pnand %p858_p9, %p857_p8 }
 0x1a1   : > { %572 = dma.done.wait (!%p420_p0), %s309_s30, 128  }
 0x1a2   : > { %574 = vsyncadd (!%p420_p0), %s309_s30, 4294967168  ;;  %p20_p1 = scmp.ge.s32.totalorder %s644_s21, 4   ;;  %s859_s15 = smov %s581_s16 }
 0x1a3   : > { %s860_s16 = smov %s585_s17  ;;  %s861_s17 = smov %s656_s24 }
 0x1a4   : > { %s862_s18 = smov %s644_s21  ;;  %22 = sbr.rel (!%p20_p1) target bundleno = 7 (0x7), region = 94 }
 0x1ab   :  { %314 = vsyncpa [#allocation3], 1 }
 0x1ac   :  { %316 = vsyncpa [#allocation3 + $0x1], 1 }
 0x1ad   :  { %317 = vsyncpa [#allocation6], 1 }
 0x1ae   :  { %319 = vsyncpa [#allocation6 + $0x1], 1 }
 0x1af   :  { %320 = vsyncpa [#allocation4], 1 }
 0x1b0   :  { %322 = vsyncpa [#allocation4 + $0x1], 1 }

</bundles_post_ra>
